<compile_context>
chip_gen: v5e
topology: v5e:2x2
jax: 0.10.0
libtpu: 0.0.40
codegen_flags: <defaults>
</compile_context>

<pallas_src>
import math

import jax
import jax.numpy as jnp
from jax.experimental import pallas as pl
from jax.experimental.pallas import tpu as pltpu

# ----------------------------------------------------------------------------
# Logical model hyper-parameters (small but consistent with the module's
# forward pass; keeps the quirk that fc1's out_features == batch_size).
# ----------------------------------------------------------------------------
BATCH_SIZE = 8          # self.batch_size (also fc1's logical out_features)
INPUT_LENGTH = 32       # x_train.shape[1]
NUM_CLASSES = 4

LAYER_DIMS = [INPUT_LENGTH, BATCH_SIZE, 128, 256, 512, NUM_CLASSES]

LANE = 128
SUBLANE_BF16 = 16       # bf16 sublane granularity (rows)


def _round_up(x, m):
    return (x + m - 1) // m * m


# Lane-padded layer widths: every out width rounded up to a multiple of 128 so
# all matmuls / the final store are lane-dense (no masked vst).
PADDED_OUT = [_round_up(d, LANE) for d in LAYER_DIMS[1:]]   # [128,128,256,512,128]
PADDED_IN = [INPUT_LENGTH] + PADDED_OUT[:-1]                # [32,128,128,256,512]

# Static offsets of each (padded) bias inside the packed bias buffer.
BIAS_OFFSETS = [0]
for _d in PADDED_OUT:
    BIAS_OFFSETS.append(BIAS_OFFSETS[-1] + _d)
TOTAL_BIAS = BIAS_OFFSETS[-1]                               # 1152 (= 9 * 128)


def _choose_tm(batch):
    """Pick the batch-tile row count.

    * Never below 16 (bf16 sublane granularity).
    * Small batches: smallest 16-multiple covering the batch (no 128-row
      padding waste at B=8).
    * Larger batches: grow toward 512 rows so per-step MXU work dwarfs the
      ~0.35us per-grid-step overhead, but cap at half the padded batch so the
      "parallel" grid axis keeps >= 2 steps (both v7x TensorCores get work).
    """
    b16 = _round_up(batch, SUBLANE_BF16)
    if b16 <= SUBLANE_BF16:
        return SUBLANE_BF16
    return max(SUBLANE_BF16, min(512, _round_up(b16 // 2, SUBLANE_BF16)))


def mlp_kernel(x_ref,
               w1_ref, w2_ref, w3_ref, w4_ref, w5_ref,
               b_ref,
               o_ref):
    """Fused 5-layer MLP over one (TM, INPUT_LENGTH) bf16 batch tile.

    Weights are bf16 and VMEM-resident (constant index_maps); biases are one
    packed f32 buffer sliced at static, lane-aligned offsets.  All matmuls
    accumulate in f32 on the MXU; ReLU runs in f32 before the bf16 downcast.
    """
    h = x_ref[...]   # already bf16 (cast in the wrapper)

    def bias(idx):
        return b_ref[:, BIAS_OFFSETS[idx]:BIAS_OFFSETS[idx + 1]]

    def linear_relu(h_bf16, w_ref, idx):
        y = jnp.dot(h_bf16, w_ref[...], preferred_element_type=jnp.float32)
        y = y + bias(idx)
        # Keep the max in f32 (v5e has no bf16 VALU path), then a single pack.
        return jnp.maximum(y, 0.0).astype(jnp.bfloat16)

    h = linear_relu(h, w1_ref, 0)
    h = linear_relu(h, w2_ref, 1)
    h = linear_relu(h, w3_ref, 2)
    h = linear_relu(h, w4_ref, 3)
    # Final layer: no ReLU; bf16 writeback (lane-dense (TM, 128) store, half
    # the HBM writeback bytes of f32).
    out = jnp.dot(h, w5_ref[...], preferred_element_type=jnp.float32) + bias(4)
    o_ref[...] = out.astype(o_ref.dtype)


def net_forward(x, params):
    """x: (B, input_length) float32. Returns (B, NUM_CLASSES) float32."""
    weights = params["weights"]            # 5 bf16 arrays, (in_pad, out_pad)
    biases = params["biases_packed"]       # (1, TOTAL_BIAS) float32

    batch = x.shape[0]
    x2d = x.reshape(batch, -1)             # x.view(self.batch_size, -1)
    assert x2d.shape[1] == INPUT_LENGTH

    # Half the input DMA bytes + MXU-native LHS dtype; matches the in-kernel
    # bf16 compute path so semantics are unchanged vs. the previous version.
    x2d = x2d.astype(jnp.bfloat16)

    tm = _choose_tm(batch)
    b_pad = _round_up(batch, tm)
    if b_pad != batch:
        x2d = jnp.pad(x2d, ((0, b_pad - batch), (0, 0)))

    grid = (b_pad // tm,)
    out_pad = PADDED_OUT[-1]

    # Advisory cost hint so XLA schedules this tiny custom call sensibly.
    flops = 2 * b_pad * sum(i * o for i, o in zip(PADDED_IN, PADDED_OUT))
    bytes_accessed = (
        x2d.size * 2                         # bf16 input
        + sum(w.size * 2 for w in weights)   # bf16 weights
        + biases.size * 4                    # f32 packed biases
        + b_pad * out_pad * 2                # bf16 output
    )

    # Weights/biases: full-array blocks with constant index_maps -> fetched once
    # and kept VMEM-resident across grid steps.  x/out: tiled over the batch.
    weight_specs = [pl.BlockSpec(w.shape, lambda i: (0, 0)) for w in weights]
    in_specs = (
        [pl.BlockSpec((tm, INPUT_LENGTH), lambda i: (i, 0))]
        + weight_specs
        + [pl.BlockSpec((1, TOTAL_BIAS), lambda i: (0, 0))]
    )

    # Total VMEM footprint (~0.5 MiB of weights + <1.5 MiB of double-buffered
    # activation/output tiles even at TM=512) is far under the default scoped
    # limit on v5e/v6e/v7x, so no vmem_limit_bytes override is needed.
    out = pl.pallas_call(
        mlp_kernel,
        out_shape=jax.ShapeDtypeStruct((b_pad, out_pad), jnp.bfloat16),
        grid=grid,
        in_specs=in_specs,
        out_specs=pl.BlockSpec((tm, out_pad), lambda i: (i, 0)),
        compiler_params=pltpu.CompilerParams(
            dimension_semantics=("parallel",),   # v7x: shard batch tiles over 2 TCs
        ),
        cost_estimate=pl.CostEstimate(
            flops=flops, transcendentals=0, bytes_accessed=bytes_accessed),
    )(x2d, *weights, biases)

    # Drop batch padding / zero-padded output lanes, return f32 logits.
    return out[:batch, :NUM_CLASSES].astype(jnp.float32)


def init_params(key):
    """nn.Linear-style init (uniform +-1/sqrt(fan_in)), stored TPU-friendly:

    - weights: (in_padded, out_padded) bf16, zero-padded in the extra rows/cols
      (zero padding is required so padded fc1 lanes feed zeros into fc2, etc.)
    - biases:  one packed (1, TOTAL_BIAS) f32 buffer, zero-padded per layer
    """
    weights = []
    bias_parts = []
    for li in range(5):
        fan_in, fan_out = LAYER_DIMS[li], LAYER_DIMS[li + 1]
        pad_in, pad_out = PADDED_IN[li], PADDED_OUT[li]
        key, wk, bk = jax.random.split(key, 3)
        bound = 1.0 / math.sqrt(fan_in)
        w = jax.random.uniform(wk, (fan_in, fan_out), jnp.float32, -bound, bound)
        b = jax.random.uniform(bk, (fan_out,), jnp.float32, -bound, bound)
        w_padded = jnp.zeros((pad_in, pad_out), jnp.float32)
        w_padded = w_padded.at[:fan_in, :fan_out].set(w)
        b_padded = jnp.zeros((pad_out,), jnp.float32).at[:fan_out].set(b)
        weights.append(w_padded.astype(jnp.bfloat16))
        bias_parts.append(b_padded)
    biases_packed = jnp.concatenate(bias_parts).reshape(1, TOTAL_BIAS)
    return {"weights": weights, "biases_packed": biases_packed}


def reference_forward(x, params):
    """Pure-JAX reference mirroring the kernel's bf16-matmul / f32-accumulate path."""
    h = x.reshape(x.shape[0], -1).astype(jnp.bfloat16)
    y = None
    for li in range(5):
        w = params["weights"][li]
        b = params["biases_packed"][0, BIAS_OFFSETS[li]:BIAS_OFFSETS[li + 1]]
        y = jnp.dot(h, w, preferred_element_type=jnp.float32) + b
        if li < 4:
            h = jnp.maximum(y, 0.0).astype(jnp.bfloat16)
    # Match the kernel's bf16 output writeback before the f32 logits view.
    y = y.astype(jnp.bfloat16).astype(jnp.float32)
    return y[:, :NUM_CLASSES]


if __name__ == "__main__":
    key = jax.random.PRNGKey(0)
    key, xk = jax.random.split(key)
    x = jax.random.normal(xk, (BATCH_SIZE, INPUT_LENGTH), dtype=jnp.float32)

    params = init_params(key)

    out = jax.block_until_ready(net_forward(x, params))

    ref = reference_forward(x, params)
    assert out.shape == (BATCH_SIZE, NUM_CLASSES), out.shape
    assert out.dtype == jnp.float32, out.dtype
    assert jnp.allclose(out, ref, atol=2e-2, rtol=2e-2), "mismatch vs JAX reference"

    print("KERNEL_OK")
</pallas_src>

<mosaic_0001>
module attributes {stable_mosaic.version = 11 : i64} {
  func.func @mlp_kernel(%arg0: i32, %arg1: memref<16x32xbf16, #tpu.memory_space<vmem>>, %arg2: memref<32x128xbf16, #tpu.memory_space<vmem>>, %arg3: memref<128x128xbf16, #tpu.memory_space<vmem>>, %arg4: memref<128x256xbf16, #tpu.memory_space<vmem>>, %arg5: memref<256x512xbf16, #tpu.memory_space<vmem>>, %arg6: memref<512x128xbf16, #tpu.memory_space<vmem>>, %arg7: memref<1x1152xf32, #tpu.memory_space<vmem>>, %arg8: memref<16x128xbf16, #tpu.memory_space<vmem>>) attributes {dimension_semantics = [#tpu.dimension_semantics<parallel>], iteration_bounds = array<i64: 1>, scalar_prefetch = 0 : i64, scratch_operands = 0 : i64, tpu.core_type = #tpu.core_type<tc>, window_params = [{transform_indices = @transform_0, window_bounds = array<i64: 16, 32>}, {pipeline_mode = #tpu.pipeline_mode<synchronous>, transform_indices = @transform_1, window_bounds = array<i64: 32, 128>}, {pipeline_mode = #tpu.pipeline_mode<synchronous>, transform_indices = @transform_2, window_bounds = array<i64: 128, 128>}, {pipeline_mode = #tpu.pipeline_mode<synchronous>, transform_indices = @transform_3, window_bounds = array<i64: 128, 256>}, {pipeline_mode = #tpu.pipeline_mode<synchronous>, transform_indices = @transform_4, window_bounds = array<i64: 256, 512>}, {pipeline_mode = #tpu.pipeline_mode<synchronous>, transform_indices = @transform_5, window_bounds = array<i64: 512, 128>}, {pipeline_mode = #tpu.pipeline_mode<synchronous>, transform_indices = @transform_6, window_bounds = array<i64: 1, 1152>}, {transform_indices = @transform_7, window_bounds = array<i64: 16, 128>}]} {
    %c0 = arith.constant 0 : index
    %c0_0 = arith.constant 0 : index
    %0 = vector.load %arg1[%c0, %c0_0] : memref<16x32xbf16, #tpu.memory_space<vmem>>, vector<16x32xbf16>
    %c0_1 = arith.constant 0 : index
    %c0_2 = arith.constant 0 : index
    %1 = vector.load %arg2[%c0_1, %c0_2] : memref<32x128xbf16, #tpu.memory_space<vmem>>, vector<32x128xbf16>
    %cst = arith.constant dense<0.000000e+00> : vector<16x128xf32>
    %2 = tpu.matmul %0, %1, %cst {dimension_numbers = #tpu.dot_dimension_numbers<[1], [0], [0], [1], [0, 0, 1, 1], [], []>} : vector<16x32xbf16>, vector<32x128xbf16>, vector<16x128xf32> -> vector<16x128xf32>
    %c0_3 = arith.constant 0 : index
    %c0_4 = arith.constant 0 : index
    %3 = vector.load %arg7[%c0_3, %c0_4] : memref<1x1152xf32, #tpu.memory_space<vmem>>, vector<1x128xf32>
    %4 = vector.broadcast %3 : vector<1x128xf32> to vector<16x128xf32>
    %5 = arith.addf %2, %4 : vector<16x128xf32>
    %cst_5 = arith.constant 0.000000e+00 : f32
    %6 = vector.broadcast %cst_5 : f32 to vector<16x128xf32>
    %7 = arith.maximumf %5, %6 : vector<16x128xf32>
    %8 = arith.truncf %7 : vector<16x128xf32> to vector<16x128xbf16>
    %c0_6 = arith.constant 0 : index
    %c0_7 = arith.constant 0 : index
    %9 = vector.load %arg3[%c0_6, %c0_7] : memref<128x128xbf16, #tpu.memory_space<vmem>>, vector<128x128xbf16>
    %cst_8 = arith.constant dense<0.000000e+00> : vector<16x128xf32>
    %10 = tpu.matmul %8, %9, %cst_8 {dimension_numbers = #tpu.dot_dimension_numbers<[1], [0], [0], [1], [0, 0, 1, 1], [], []>} : vector<16x128xbf16>, vector<128x128xbf16>, vector<16x128xf32> -> vector<16x128xf32>
    %c0_9 = arith.constant 0 : index
    %c128 = arith.constant 128 : index
    %11 = vector.load %arg7[%c0_9, %c128] : memref<1x1152xf32, #tpu.memory_space<vmem>>, vector<1x128xf32>
    %12 = vector.broadcast %11 : vector<1x128xf32> to vector<16x128xf32>
    %13 = arith.addf %10, %12 : vector<16x128xf32>
    %cst_10 = arith.constant 0.000000e+00 : f32
    %14 = vector.broadcast %cst_10 : f32 to vector<16x128xf32>
    %15 = arith.maximumf %13, %14 : vector<16x128xf32>
    %16 = arith.truncf %15 : vector<16x128xf32> to vector<16x128xbf16>
    %c0_11 = arith.constant 0 : index
    %c0_12 = arith.constant 0 : index
    %17 = vector.load %arg4[%c0_11, %c0_12] : memref<128x256xbf16, #tpu.memory_space<vmem>>, vector<128x256xbf16>
    %cst_13 = arith.constant dense<0.000000e+00> : vector<16x256xf32>
    %18 = tpu.matmul %16, %17, %cst_13 {dimension_numbers = #tpu.dot_dimension_numbers<[1], [0], [0], [1], [0, 0, 1, 1], [], []>} : vector<16x128xbf16>, vector<128x256xbf16>, vector<16x256xf32> -> vector<16x256xf32>
    %c0_14 = arith.constant 0 : index
    %c256 = arith.constant 256 : index
    %19 = vector.load %arg7[%c0_14, %c256] : memref<1x1152xf32, #tpu.memory_space<vmem>>, vector<1x256xf32>
    %20 = vector.broadcast %19 : vector<1x256xf32> to vector<16x256xf32>
    %21 = arith.addf %18, %20 : vector<16x256xf32>
    %cst_15 = arith.constant 0.000000e+00 : f32
    %22 = vector.broadcast %cst_15 : f32 to vector<16x256xf32>
    %23 = arith.maximumf %21, %22 : vector<16x256xf32>
    %24 = arith.truncf %23 : vector<16x256xf32> to vector<16x256xbf16>
    %c0_16 = arith.constant 0 : index
    %c0_17 = arith.constant 0 : index
    %25 = vector.load %arg5[%c0_16, %c0_17] : memref<256x512xbf16, #tpu.memory_space<vmem>>, vector<256x512xbf16>
    %cst_18 = arith.constant dense<0.000000e+00> : vector<16x512xf32>
    %26 = tpu.matmul %24, %25, %cst_18 {dimension_numbers = #tpu.dot_dimension_numbers<[1], [0], [0], [1], [0, 0, 1, 1], [], []>} : vector<16x256xbf16>, vector<256x512xbf16>, vector<16x512xf32> -> vector<16x512xf32>
    %c0_19 = arith.constant 0 : index
    %c512 = arith.constant 512 : index
    %27 = vector.load %arg7[%c0_19, %c512] : memref<1x1152xf32, #tpu.memory_space<vmem>>, vector<1x512xf32>
    %28 = vector.broadcast %27 : vector<1x512xf32> to vector<16x512xf32>
    %29 = arith.addf %26, %28 : vector<16x512xf32>
    %cst_20 = arith.constant 0.000000e+00 : f32
    %30 = vector.broadcast %cst_20 : f32 to vector<16x512xf32>
    %31 = arith.maximumf %29, %30 : vector<16x512xf32>
    %32 = arith.truncf %31 : vector<16x512xf32> to vector<16x512xbf16>
    %c0_21 = arith.constant 0 : index
    %c0_22 = arith.constant 0 : index
    %33 = vector.load %arg6[%c0_21, %c0_22] : memref<512x128xbf16, #tpu.memory_space<vmem>>, vector<512x128xbf16>
    %cst_23 = arith.constant dense<0.000000e+00> : vector<16x128xf32>
    %34 = tpu.matmul %32, %33, %cst_23 {dimension_numbers = #tpu.dot_dimension_numbers<[1], [0], [0], [1], [0, 0, 1, 1], [], []>} : vector<16x512xbf16>, vector<512x128xbf16>, vector<16x128xf32> -> vector<16x128xf32>
    %c0_24 = arith.constant 0 : index
    %c1024 = arith.constant 1024 : index
    %35 = vector.load %arg7[%c0_24, %c1024] : memref<1x1152xf32, #tpu.memory_space<vmem>>, vector<1x128xf32>
    %36 = vector.broadcast %35 : vector<1x128xf32> to vector<16x128xf32>
    %37 = arith.addf %34, %36 : vector<16x128xf32>
    %38 = arith.truncf %37 : vector<16x128xf32> to vector<16x128xbf16>
    %c0_25 = arith.constant 0 : index
    %c0_26 = arith.constant 0 : index
    %39 = vector.load %arg8[%c0_25, %c0_26] : memref<16x128xbf16, #tpu.memory_space<vmem>>, vector<16x128xbf16>
    tpu.vector_store %arg8[%c0_25, %c0_26], %38 {strides = array<i32>} : memref<16x128xbf16, #tpu.memory_space<vmem>>, vector<16x128xbf16>,
    return
  }
  func.func @transform_0(%arg0: i32) -> (i32, i32) {
    %c0_i32 = arith.constant 0 : i32
    %c0_i32_0 = arith.constant 0 : i32
    return %arg0, %c0_i32 : i32, i32
  }
  func.func @transform_1(%arg0: i32) -> (i32, i32) {
    %c0_i32 = arith.constant 0 : i32
    %c0_i32_0 = arith.constant 0 : i32
    %c0_i32_1 = arith.constant 0 : i32
    return %c0_i32, %c0_i32_0 : i32, i32
  }
  func.func @transform_2(%arg0: i32) -> (i32, i32) {
    %c0_i32 = arith.constant 0 : i32
    %c0_i32_0 = arith.constant 0 : i32
    %c0_i32_1 = arith.constant 0 : i32
    return %c0_i32, %c0_i32_0 : i32, i32
  }
  func.func @transform_3(%arg0: i32) -> (i32, i32) {
    %c0_i32 = arith.constant 0 : i32
    %c0_i32_0 = arith.constant 0 : i32
    %c0_i32_1 = arith.constant 0 : i32
    return %c0_i32, %c0_i32_0 : i32, i32
  }
  func.func @transform_4(%arg0: i32) -> (i32, i32) {
    %c0_i32 = arith.constant 0 : i32
    %c0_i32_0 = arith.constant 0 : i32
    %c0_i32_1 = arith.constant 0 : i32
    return %c0_i32, %c0_i32_0 : i32, i32
  }
  func.func @transform_5(%arg0: i32) -> (i32, i32) {
    %c0_i32 = arith.constant 0 : i32
    %c0_i32_0 = arith.constant 0 : i32
    %c0_i32_1 = arith.constant 0 : i32
    return %c0_i32, %c0_i32_0 : i32, i32
  }
  func.func @transform_6(%arg0: i32) -> (i32, i32) {
    %c0_i32 = arith.constant 0 : i32
    %c0_i32_0 = arith.constant 0 : i32
    %c0_i32_1 = arith.constant 0 : i32
    return %c0_i32, %c0_i32_0 : i32, i32
  }
  func.func @transform_7(%arg0: i32) -> (i32, i32) {
    %c0_i32 = arith.constant 0 : i32
    %c0_i32_0 = arith.constant 0 : i32
    return %arg0, %c0_i32 : i32, i32
  }
}

</mosaic_0001>

<bundles_post_ra>
// kernel: tpu_custom_call.1
= control target key start
LH: loop header
LB: loop body
LE: loop exit
PB: predicated region body
PF: predicated region fallthrough
CT: control target
= control target key end

     0   :  { %12 = vsyncpa [#allocation3], 0  ;;  %s2197_s0 = inlined_call_operand.hbm [shape: bf16[16,32], index: 0, kind: input, shape index: {}]   ;;  %s2198_s1 = inlined_call_operand.hbm [shape: bf16[32,128], index: 1, kind: input, shape index: {}]   ;;  %s2199_s2 = inlined_call_operand.hbm [shape: bf16[128,128], index: 2, kind: input, shape index: {}]   ;;  %s2200_s3 = inlined_call_operand.hbm [shape: bf16[128,256], index: 3, kind: input, shape index: {}]   ;;  %s2201_s4 = inlined_call_operand.hbm [shape: bf16[256,512], index: 4, kind: input, shape index: {}]   ;;  %s2202_s5 = inlined_call_operand.hbm [shape: bf16[512,128], index: 5, kind: input, shape index: {}]   ;;  %s2203_s6 = inlined_call_operand.hbm [shape: f32[1,1152], index: 6, kind: input, shape index: {}]   ;;  %s2204_s7 = inlined_call_operand.hbm [shape: bf16[16,128], index: 7, kind: output, shape index: {}]  }
   0x1   :  { %13 = vsyncpa [#allocation6], 0 }
   0x2   :  { %14 = vsyncpa [#allocation9], 0 }
   0x3   :  { %15 = vsyncpa [#allocation12], 0 }
   0x4   :  { %16 = vsyncpa [#allocation4], 0  ;;  %s34_s26 = sshll.u32 %s2198_s1, 4  ;;  %s2104_s27 = smov [#allocation5]   ;;  %s35_s26 = int_to_ptr.hbm [resolvable:$true] %s34_s26 }
   0x5   :  { %s36_s28 = sshll.u32 %s2104_s27, 4  ;;  %s60_s8 = sshll.u32 %s2200_s3, 4  ;;  %s37_s28 = int_to_ptr.vmem [resolvable:$true] %s36_s28  ;;  %s61_s8 = int_to_ptr.hbm [resolvable:$true] %s60_s8 }
   0x6   :  { %s2105_s9 = smov 64   ;;  %s2106_s10 = smov 4  }
   0x7   :  { %42 = dma.hbm_to_vmem [thread:$0]  %s35_s26, 256, %s37_s28, [#allocation6], %s2105_s9, %s2105_s9, %s2106_s10  }
   0x8   :  { %s2107_s11 = smov [#allocation8]   ;;  %s2108_s13 = smov 128  }
   0x9   :  { %s62_s12 = sshll.u32 %s2107_s11, 4  ;;  %s2109_s1 = smov 8   ;;  %s63_s12 = int_to_ptr.vmem [resolvable:$true] %s62_s12 }
   0xa   :  { %68 = dma.hbm_to_vmem [thread:$0]  %s61_s8, 2048, %s63_s12, [#allocation9], %s2108_s13, %s2108_s13, %s2109_s1  }
   0xb   :  { %s86_s16 = sshll.u32 %s2202_s5, 4  ;;  %s2110_s17 = smov [#allocation11]   ;;  %s87_s16 = int_to_ptr.hbm [resolvable:$true] %s86_s16 }
   0xc   :  { %s88_s3 = sshll.u32 %s2110_s17, 4  ;;  %s21_s20 = sshll.u32 %s2197_s0, 4  ;;  %s89_s3 = int_to_ptr.vmem [resolvable:$true] %s88_s3  ;;  %s22_s20 = int_to_ptr.hbm [resolvable:$true] %s21_s20 }
   0xd   :  { %94 = dma.hbm_to_vmem [thread:$0]  %s87_s16, 4096, %s89_s3, [#allocation12], %s2105_s9, %s2105_s9, %s2106_s10  }
   0xe   :  { %s2111_s21 = smov [#allocation2]   ;;  %s47_s25 = sshll.u32 %s2199_s2, 4  ;;  %s48_s25 = int_to_ptr.hbm [resolvable:$true] %s47_s25 }
   0xf   :  { %s23_s22 = sshll.u32 %s2111_s21, 4  ;;  %s73_s0 = sshll.u32 %s2201_s4, 4  ;;  %s24_s22 = int_to_ptr.vmem [resolvable:$true] %s23_s22  ;;  %s74_s0 = int_to_ptr.hbm [resolvable:$true] %s73_s0 }
  0x10   :  { %29 = dma.hbm_to_vmem [thread:$0]  %s22_s20, 128, %s24_s22, [#allocation3], %s2105_s9, %s2105_s9, %s2106_s10  }
  0x11   :  { %s2112_s27 = smov [#allocation7]   ;;  %s2113_s29 = smov [#allocation10]  }
  0x12   :  { %s49_s28 = sshll.u32 %s2112_s27, 4  ;;  %s75_s2 = sshll.u32 %s2113_s29, 4  ;;  %s50_s28 = int_to_ptr.vmem [resolvable:$true] %s49_s28  ;;  %s76_s2 = int_to_ptr.vmem [resolvable:$true] %s75_s2 }
  0x13   :  { %55 = dma.hbm_to_vmem [thread:$0]  %s48_s25, 1024, %s50_s28, [#allocation6], %s2105_s9, %s2105_s9, %s2106_s10  }
  0x14   :  { %s2114_s30 = smov 256   ;;  %s2115_s8 = smov 16  }
  0x15   :  { %81 = dma.hbm_to_vmem [thread:$0]  %s74_s0, 8192, %s76_s2, [#allocation9], %s2114_s30, %s2114_s30, %s2115_s8  }
  0x16   :  { %s100_s13 = sshll.u32 %s2203_s6, 4  ;;  %s2116_s4 = smov [#allocation13]   ;;  %s101_s13 = int_to_ptr.hbm [resolvable:$true] %s100_s13 }
  0x17   :  { %s102_s1 = sshll.u32 %s2116_s4, 4  ;;  %s103_s1 = int_to_ptr.vmem [resolvable:$true] %s102_s1 }
  0x18   :  { %105 = dma.hbm_to_vmem [thread:$0]  %s101_s13, 144, %s103_s1, [#allocation12]  }
  0x19   :  { %2094 = dma.done.wait [#allocation3], 128  }
  0x1a   :  { %2095 = vsyncadd [#allocation3], 4294967168 }
  0x1b   :  { %2096 = dma.done.wait [#allocation6], 1280  }
  0x1c   :  { %2097 = vsyncadd [#allocation6], 4294966016 }
  0x1d   :  { %2098 = dma.done.wait [#allocation9], 10240  }
  0x1e   :  { %2099 = vsyncadd [#allocation9], 4294957056 }
  0x1f   :  { %2100 = dma.done.wait [#allocation12], 4240  }
  0x20   :  { %2101 = vsyncadd [#allocation12], 4294963056  ;;  %v1759_v0 = vld [vmem:[#allocation5 + $0x8] sm:$0xff]  ;;  %v1758_v2 = vld [vmem:[#allocation5] sm:$0xff]  ;;  %vm162_vm0 = vcmask 261120   ;;  %s2117_s6 = smov [#allocation14]  }
  0x21   :  { %v1767_v1 = vld [vmem:[#allocation7 + $0x38] sm:$0xff]  ;;  %172 = vmatpush.bf16.msra.mxu0 %v1759_v0  ;;  %v1766_v3 = vld [vmem:[#allocation7 + $0x30] sm:$0xff]  ;;  %v1757_v4 = vld [vmem:[#allocation2] sm:$0xff]  ;;  %s1246_s14 = sshll.u32 %s2117_s6, 4  ;;  %s1248_s17 = sshll.u32 %s2204_s7, 4  ;;  %s1247_s14 = int_to_ptr.vmem [resolvable:$true] %s1246_s14  ;;  %s1249_s17 = int_to_ptr.hbm [resolvable:$true] %s1248_s17 }
  0x22   :  { %251 = vmatpush.bf16.msra.mxu1 %v1767_v1  ;;  %v1765_v5 = vld [vmem:[#allocation7 + $0x28] sm:$0xff]  ;;  %v1764_v6 = vld [vmem:[#allocation7 + $0x20] sm:$0xff]  ;;  %v1763_v7 = vld [vmem:[#allocation7 + $0x18] sm:$0xff] }
  0x23   :  { %v1762_v8 = vld [vmem:[#allocation7 + $0x10] sm:$0xff]  ;;  %v1761_v9 = vld [vmem:[#allocation7 + $0x8] sm:$0xff]  ;;  %v1760_v10 = vld [vmem:[#allocation7] sm:$0xff] }
  0x24   :  { %v1367_v11 = vld [vmem:[#allocation8 + $0x70] sm:$0xf]  ;;  %v1783_v12 = vld [vmem:[#allocation8 + $0x74] sm:$0xf0]  ;;  %v1782_v13 = vld [vmem:[#allocation8 + $0x74] sm:$0xf] }
  0x25   :  { %173 = vmatpush.bf16.msra.mxu0 %v1758_v2  ;;  %v1368_v14 = vor.u32 %v1783_v12, %v1367_v11  ;;  %v1369_v15 = vld [vmem:[#allocation8 + $0x78] sm:$0xf0]  ;;  %v1359_v16 = vld [vmem:[#allocation8 + $0x60] sm:$0xf]  ;;  %v1781_v17 = vld [vmem:[#allocation8 + $0x64] sm:$0xf0] }
  0x26   :  { %252 = vmatpush.bf16.msra.mxu1 %v1766_v3  ;;  %v1372_v18 = vor.u32 %v1782_v13, %v1369_v15  ;;  %v1780_v19 = vld [vmem:[#allocation8 + $0x64] sm:$0xf]  ;;  %v1361_v20 = vld [vmem:[#allocation8 + $0x68] sm:$0xf0]  ;;  %v1360_v21 = vor.u32 %v1781_v17, %v1359_v16  ;;  %v1351_v23 = vld [vmem:[#allocation8 + $0x50] sm:$0xf] }
  0x27   :  { %370 = vmatpush.bf16.msra.mxu2 %v1368_v14  ;;  %v1364_v22 = vor.u32 %v1780_v19, %v1361_v20  ;;  %v1779_v24 = vld [vmem:[#allocation8 + $0x54] sm:$0xf0]  ;;  %v1778_v25 = vld [vmem:[#allocation8 + $0x54] sm:$0xf]  ;;  %v1353_v26 = vld [vmem:[#allocation8 + $0x58] sm:$0xf0] }
  0x28   :  { %1276 = vmatmul.msk.bf16.vlgmr.msra.gmra.mxu0 %vm162_vm0, %v1757_v4  ;;  %384 = vmatpush.bf16.msra.mxu3 %v1372_v18  ;;  %v1352_v27 = vor.u32 %v1779_v24, %v1351_v23  ;;  %v1356_v28 = vor.u32 %v1778_v25, %v1353_v26  ;;  %v1343_v29 = vld [vmem:[#allocation8 + $0x40] sm:$0xf]  ;;  %v1777_v30 = vld [vmem:[#allocation8 + $0x44] sm:$0xf0]  ;;  %v1776_v31 = vld [vmem:[#allocation8 + $0x44] sm:$0xf] }
  0x29   :  { %v1345_v32 = vld [vmem:[#allocation8 + $0x48] sm:$0xf0]  ;;  %v1344_v33 = vor.u32 %v1777_v30, %v1343_v29  ;;  %v1899_v36 = vld [vmem:[#allocation13] ss:$0 sm:$0xff]  ;;  %v1335_v43 = vld [vmem:[#allocation8 + $0x30] sm:$0xf] }
  0x2a   :  { %253 = vmatpush.bf16.msra.mxu1 %v1765_v5  ;;  %v1348_v34 = vor.u32 %v1776_v31, %v1345_v32  ;;  %v1775_v44 = vld [vmem:[#allocation8 + $0x34] sm:$0xf0]  ;;  %v1774_v45 = vld [vmem:[#allocation8 + $0x34] sm:$0xf]  ;;  %v1337_v47 = vld [vmem:[#allocation8 + $0x38] sm:$0xf0] }
  0x2b   :  { %371 = vmatpush.bf16.msra.mxu2 %v1360_v21  ;;  %v1336_v46 = vor.u32 %v1775_v44, %v1335_v43  ;;  %v1340_v48 = vor.u32 %v1774_v45, %v1337_v47  ;;  %v1327_v49 = vld [vmem:[#allocation8 + $0x20] sm:$0xf]  ;;  %v1773_v50 = vld [vmem:[#allocation8 + $0x24] sm:$0xf0]  ;;  %v1772_v51 = vld [vmem:[#allocation8 + $0x24] sm:$0xf] }
  0x2c   :  { %385 = vmatpush.bf16.msra.mxu3 %v1364_v22  ;;  %v1328_v52 = vor.u32 %v1773_v50, %v1327_v49  ;;  %v1329_v53 = vld [vmem:[#allocation8 + $0x28] sm:$0xf0]  ;;  %v1319_v55 = vld [vmem:[#allocation8 + $0x10] sm:$0xf]  ;;  %v1771_v56 = vld [vmem:[#allocation8 + $0x14] sm:$0xf0] }
  0x2d   :  { %v1332_v54 = vor.u32 %v1772_v51, %v1329_v53  ;;  %v1770_v57 = vld [vmem:[#allocation8 + $0x14] sm:$0xf]  ;;  %v1320_v58 = vor.u32 %v1771_v56, %v1319_v55  ;;  %v1321_v59 = vld [vmem:[#allocation8 + $0x18] sm:$0xf0]  ;;  %v1311_v61 = vld [vmem:[#allocation8] sm:$0xf] }
  0x2e   :  { %254 = vmatpush.bf16.msra.mxu1 %v1764_v6  ;;  %v1324_v60 = vor.u32 %v1770_v57, %v1321_v59  ;;  %v1769_v62 = vld [vmem:[#allocation8 + $0x4] sm:$0xf0]  ;;  %v1768_v63 = vld [vmem:[#allocation8 + $0x4] sm:$0xf]  ;;  %v1313_v1 = vld [vmem:[#allocation8 + $0x8] sm:$0xf0] }
  0x2f   :  { %372 = vmatpush.bf16.msra.mxu2 %v1352_v27  ;;  %v1312_v0 = vor.u32 %v1769_v62, %v1311_v61  ;;  %v1316_v2 = vor.u32 %v1768_v63, %v1313_v1  ;;  %v1487_v3 = vld [vmem:[#allocation10 + $0xe0] sm:$0xf]  ;;  %v1814_v4 = vld [vmem:[#allocation10 + $0xec] sm:$0xf0]  ;;  %v1844_v12 = vld [vmem:[#allocation10 + $0x1e4] sm:$0xf] }
  0x30   :  { %386 = vmatpush.bf16.msra.mxu3 %v1356_v28  ;;  %v1615_v5 = vld [vmem:[#allocation10 + $0x1e0] sm:$0xf]  ;;  %v1488_v6 = vor.u32 %v1814_v4, %v1487_v3  ;;  %v1617_v13 = vld [vmem:[#allocation10 + $0x1f0] sm:$0xf0]  ;;  %v1810_v16 = vld [vmem:[#allocation10 + $0xcc] sm:$0xf0] }
  0x31   :  { %v1471_v14 = vld [vmem:[#allocation10 + $0xc0] sm:$0xf]  ;;  %v1620_v15 = vor.u32 %v1844_v12, %v1617_v13  ;;  %v1842_v18 = vld [vmem:[#allocation10 + $0x1cc] sm:$0xf0]  ;;  %v1808_v21 = vld [vmem:[#allocation10 + $0xc4] sm:$0xf] }
  0x32   :  { %255 = vmatpush.bf16.msra.mxu1 %v1763_v7  ;;  %v1846_v7 = vld [vmem:[#allocation10 + $0x1ec] sm:$0xf0]  ;;  %798 = vmatpush.bf16.msrb.mxu0 %v1488_v6  ;;  %v1599_v17 = vld [vmem:[#allocation10 + $0x1c0] sm:$0xf]  ;;  %v1472_v19 = vor.u32 %v1810_v16, %v1471_v14  ;;  %v1473_v22 = vld [vmem:[#allocation10 + $0xd0] sm:$0xf0] }
  0x33   :  { %373 = vmatpush.bf16.msra.mxu2 %v1344_v33  ;;  %v1600_v20 = vor.u32 %v1842_v18, %v1599_v17  ;;  %v1840_v23 = vld [vmem:[#allocation10 + $0x1c4] sm:$0xf]  ;;  %v1476_v24 = vor.u32 %v1808_v21, %v1473_v22  ;;  %v1601_v25 = vld [vmem:[#allocation10 + $0x1d0] sm:$0xf0]  ;;  %v1455_v26 = vld [vmem:[#allocation10 + $0xa0] sm:$0xf] }
  0x34   :  { %387 = vmatpush.bf16.msra.mxu3 %v1348_v34  ;;  %v1806_v27 = vld [vmem:[#allocation10 + $0xac] sm:$0xf0]  ;;  %v1604_v28 = vor.u32 %v1840_v23, %v1601_v25  ;;  %v1583_v29 = vld [vmem:[#allocation10 + $0x1a0] sm:$0xf]  ;;  %v1804_v31 = vld [vmem:[#allocation10 + $0xa4] sm:$0xf] }
  0x35   :  { %v1838_v30 = vld [vmem:[#allocation10 + $0x1ac] sm:$0xf0]  ;;  %v1456_v32 = vor.u32 %v1806_v27, %v1455_v26  ;;  %v1457_v33 = vld [vmem:[#allocation10 + $0xb0] sm:$0xf0]  ;;  %v1836_v34 = vld [vmem:[#allocation10 + $0x1a4] sm:$0xf] }
  0x36   :  { %256 = vmatpush.bf16.msra.mxu1 %v1762_v8  ;;  %v1812_v8 = vld [vmem:[#allocation10 + $0xe4] sm:$0xf]  ;;  %799 = vmatpush.bf16.msrb.mxu0 %v1472_v19  ;;  %v1441_v44 = vld [vmem:[#allocation10 + $0x90] sm:$0xf0]  ;;  %v1423_v50 = vld [vmem:[#allocation10 + $0x60] sm:$0xf] }
  0x37   :  { %374 = vmatpush.bf16.msra.mxu2 %v1336_v46  ;;  %v1800_v43 = vld [vmem:[#allocation10 + $0x84] sm:$0xf]  ;;  %v1569_v46 = vld [vmem:[#allocation10 + $0x190] sm:$0xf0]  ;;  %v1798_v51 = vld [vmem:[#allocation10 + $0x6c] sm:$0xf0] }
  0x38   :  { %388 = vmatpush.bf16.msra.mxu3 %v1340_v48  ;;  %v1832_v45 = vld [vmem:[#allocation10 + $0x184] sm:$0xf]  ;;  %v1444_v49 = vor.u32 %v1800_v43, %v1441_v44  ;;  %v1425_v56 = vld [vmem:[#allocation10 + $0x70] sm:$0xf0]  ;;  %v1424_v59 = vor.u32 %v1798_v51, %v1423_v50  ;;  %v1407_v62 = vld [vmem:[#allocation10 + $0x40] sm:$0xf] }
  0x39   :  { %v1572_v53 = vor.u32 %v1832_v45, %v1569_v46  ;;  %v1796_v55 = vld [vmem:[#allocation10 + $0x64] sm:$0xf]  ;;  %v1794_v63 = vld [vmem:[#allocation10 + $0x4c] sm:$0xf0]  ;;  %v1391_v12 = vld [vmem:[#allocation10 + $0x20] sm:$0xf] }
  0x3a   :  { %257 = vmatpush.bf16.msra.mxu1 %v1761_v9  ;;  %v1489_v9 = vld [vmem:[#allocation10 + $0xf0] sm:$0xf0]  ;;  %800 = vmatpush.bf16.msrb.mxu0 %v1456_v32  ;;  %v1828_v57 = vld [vmem:[#allocation10 + $0x164] sm:$0xf]  ;;  %v1428_v61 = vor.u32 %v1796_v55, %v1425_v56  ;;  %v1826_v3 = vld [vmem:[#allocation10 + $0x14c] sm:$0xf0] }
  0x3b   :  { %375 = vmatpush.bf16.msra.mxu2 %v1328_v52  ;;  %v1492_v11 = vor.u32 %v1812_v8, %v1489_v9  ;;  %v1551_v52 = vld [vmem:[#allocation10 + $0x160] sm:$0xf]  ;;  %v1792_v4 = vld [vmem:[#allocation10 + $0x44] sm:$0xf]  ;;  %v1408_v9 = vor.u32 %v1794_v63, %v1407_v62  ;;  %v1790_v13 = vld [vmem:[#allocation10 + $0x2c] sm:$0xf0] }
  0x3c   :  { %389 = vmatpush.bf16.msra.mxu3 %v1332_v54  ;;  %v1830_v54 = vld [vmem:[#allocation10 + $0x16c] sm:$0xf0]  ;;  %v1824_v6 = vld [vmem:[#allocation10 + $0x144] sm:$0xf]  ;;  %v1900_v8 = vld [vmem:[#allocation13 + $0x1] ss:$0 sm:$0xff]  ;;  %v1392_v21 = vor.u32 %v1790_v13, %v1391_v12 }
  0x3d   :  { %v1519_v14 = vld [vmem:[#allocation10 + $0x120] sm:$0xf]  ;;  %v1822_v16 = vld [vmem:[#allocation10 + $0x12c] sm:$0xf0]  ;;  %v1788_v17 = vld [vmem:[#allocation10 + $0x24] sm:$0xf] }
  0x3e   :  { %258 = vmatpush.bf16.msra.mxu1 %v1760_v10  ;;  %v1616_v10 = vor.u32 %v1846_v7, %v1615_v5  ;;  %v1409_v5 = vld [vmem:[#allocation10 + $0x50] sm:$0xf0]  ;;  %v1820_v19 = vld [vmem:[#allocation10 + $0x124] sm:$0xf]  ;;  %v1520_v23 = vor.u32 %v1822_v16, %v1519_v14  ;;  %v1375_v25 = vld [vmem:[#allocation10] sm:$0xf] }
  0x3f   :  { %376 = vmatpush.bf16.msra.mxu2 %v1320_v58  ;;  %v1553_v58 = vld [vmem:[#allocation10 + $0x170] sm:$0xf0]  ;;  %v1786_v26 = vld [vmem:[#allocation10 + $0xc] sm:$0xf0]  ;;  %v1784_v32 = vld [vmem:[#allocation10 + $0x4] sm:$0xf] }
  0x40   :  { %390 = vmatpush.bf16.msra.mxu3 %v1324_v60  ;;  %v1552_v60 = vor.u32 %v1830_v54, %v1551_v52  ;;  %v1537_v7 = vld [vmem:[#allocation10 + $0x150] sm:$0xf0]  ;;  %v1495_v43 = vld [vmem:[#allocation10 + $0xe8] sm:$0xf]  ;;  %v1815_v44 = vld [vmem:[#allocation10 + $0xf4] sm:$0xf0] }
  0x41   :  { %v1393_v18 = vld [vmem:[#allocation10 + $0x30] sm:$0xf0]  ;;  %v1623_v45 = vld [vmem:[#allocation10 + $0x1e8] sm:$0xf]  ;;  %v1496_v46 = vor.u32 %v1815_v44, %v1495_v43  ;;  %v1845_v52 = vld [vmem:[#allocation10 + $0x1ec] sm:$0xf] }
  0x42   :  { %812 = vmatpush.bf16.msrb.mxu1 %v1616_v10  ;;  %v1479_v55 = vld [vmem:[#allocation10 + $0xc8] sm:$0xf]  ;;  %v1811_v56 = vld [vmem:[#allocation10 + $0xd4] sm:$0xf0]  ;;  %v1837_v12 = vld [vmem:[#allocation10 + $0x1ac] sm:$0xf] }
  0x43   :  { %377 = vmatpush.bf16.msra.mxu2 %v1312_v0  ;;  %v1535_v0 = vld [vmem:[#allocation10 + $0x140] sm:$0xf]  ;;  %v1593_v13 = vld [vmem:[#allocation10 + $0x1b8] sm:$0xf0]  ;;  %v1803_v16 = vld [vmem:[#allocation10 + $0x94] sm:$0xf0] }
  0x44   :  { %391 = vmatpush.bf16.msra.mxu3 %v1316_v2  ;;  %v1556_v2 = vor.u32 %v1828_v57, %v1553_v58  ;;  %v1536_v10 = vor.u32 %v1826_v3, %v1535_v0  ;;  %v1607_v57 = vld [vmem:[#allocation10 + $0x1c8] sm:$0xf]  ;;  %v1480_v58 = vor.u32 %v1811_v56, %v1479_v55  ;;  %v1841_v0 = vld [vmem:[#allocation10 + $0x1cc] sm:$0xf]  ;;  %v1596_v14 = vor.u32 %v1837_v12, %v1593_v13 }
  0x45   :  { %v1463_v3 = vld [vmem:[#allocation10 + $0xa8] sm:$0xf]  ;;  %v1789_v55 = vld [vmem:[#allocation10 + $0x2c] sm:$0xf] }
  0x46   :  { %813 = vmatpush.bf16.msrb.mxu1 %v1600_v20  ;;  %v1521_v20 = vld [vmem:[#allocation10 + $0x130] sm:$0xf0] }
  0x47   :  { %826 = vmatpush.bf16.msrb.mxu2 %v1492_v11  ;;  %v1412_v11 = vor.u32 %v1792_v4, %v1409_v5  ;;  %v1807_v4 = vld [vmem:[#allocation10 + $0xb4] sm:$0xf0]  ;;  %v1591_v5 = vld [vmem:[#allocation10 + $0x1a8] sm:$0xf] }
  0x48   :  { %840 = vmatpush.bf16.msrb.mxu3 %v1620_v15  ;;  %v1540_v15 = vor.u32 %v1824_v6, %v1537_v7  ;;  %v1464_v6 = vor.u32 %v1807_v4, %v1463_v3  ;;  %v1839_v7 = vld [vmem:[#allocation10 + $0x1b4] sm:$0xf0]  ;;  %v1785_v3 = vld [vmem:[#allocation10 + $0xc] sm:$0xf]  ;;  %v1385_v4 = vld [vmem:[#allocation10 + $0x18] sm:$0xf0] }
  0x4b   :  { %827 = vmatpush.bf16.msrb.mxu2 %v1476_v24  ;;  %v1396_v24 = vor.u32 %v1788_v17, %v1393_v18  ;;  %v1575_v17 = vld [vmem:[#allocation10 + $0x188] sm:$0xf] }
  0x4c   :  { %841 = vmatpush.bf16.msrb.mxu3 %v1604_v28  ;;  %v1524_v28 = vor.u32 %v1820_v19, %v1521_v20  ;;  %v1835_v19 = vld [vmem:[#allocation10 + $0x194] sm:$0xf0]  ;;  %v1801_v20 = vld [vmem:[#allocation10 + $0x8c] sm:$0xf] }
  0xa5   :  { %v175_v35 = vpop.f32.mrf.mxu0 }
  0xa6   :  { %v176_v37 = vadd.f32 %v1899_v36, %v175_v35  ;;  %v1585_v35 = vld [vmem:[#allocation10 + $0x1b0] sm:$0xf0] }
  0xa8   :  { %v180_v40 = vmax.f32 %v176_v37, 0.0  ;;  %v1460_v37 = vor.u32 %v1804_v31, %v1457_v33  ;;  %v1818_v31 = vld [vmem:[#allocation10 + $0x10c] sm:$0xf0]  ;;  %v1377_v33 = vld [vmem:[#allocation10 + $0x10] sm:$0xf0] }
  0xaa   :  { %828 = vmatpush.bf16.msrb.mxu2 %v1460_v37 }
  0xad   :  { %v177_v38 = vpop.f32.mrf.mxu0 }
  0xae   :  { %v178_v39 = vadd.f32 %v1899_v36, %v177_v38  ;;  %v1584_v36 = vor.u32 %v1838_v30, %v1583_v29  ;;  %v1439_v38 = vld [vmem:[#allocation10 + $0x80] sm:$0xf]  ;;  %829 = vmatpush.bf16.msrb.mxu2 %v1444_v49  ;;  %v1497_v49 = vld [vmem:[#allocation10 + $0xf8] sm:$0xf0] }
  0xaf   :  { %v1503_v29 = vld [vmem:[#allocation10 + $0x100] sm:$0xf] }
  0xb0   :  { %v181_v41 = vmax.f32 %v178_v39, 0.0  ;;  %v1802_v39 = vld [vmem:[#allocation10 + $0x8c] sm:$0xf0]  ;;  %814 = vmatpush.bf16.msrb.mxu1 %v1584_v36  ;;  %v1505_v36 = vld [vmem:[#allocation10 + $0x110] sm:$0xf0] }
  0xb1   :  { %v1440_v47 = vor.u32 %v1802_v39, %v1439_v38  ;;  %v1504_v39 = vor.u32 %v1818_v31, %v1503_v29  ;;  %v1559_v29 = vld [vmem:[#allocation10 + $0x168] sm:$0xf]  ;;  %v1831_v31 = vld [vmem:[#allocation10 + $0x174] sm:$0xf0] }
  0xb2   :  { %v182_v42 = vpack.c.bf16 %v181_v41, %v180_v40  ;;  %v1567_v40 = vld [vmem:[#allocation10 + $0x180] sm:$0xf]  ;;  %v1588_v41 = vor.u32 %v1836_v34, %v1585_v35  ;;  %830 = vmatpush.bf16.msrb.mxu2 %v1428_v61  ;;  %v1376_v34 = vor.u32 %v1786_v26, %v1375_v25  ;;  %v1816_v35 = vld [vmem:[#allocation10 + $0x104] sm:$0xf]  ;;  %v1481_v61 = vld [vmem:[#allocation10 + $0xd8] sm:$0xf0] }
  0xb3   :  { %801 = vmatpush.bf16.msrb.mxu0 %v1440_v47  ;;  %v1847_v47 = vld [vmem:[#allocation10 + $0x1f4] sm:$0xf0]  ;;  %v1577_v25 = vld [vmem:[#allocation10 + $0x198] sm:$0xf0] }
  0xb4   :  { %259 = vmatmul.bf16.vlgmr.msra.gmra.mxu1 %v182_v42  ;;  %v1834_v42 = vld [vmem:[#allocation10 + $0x18c] sm:$0xf0]  ;;  %842 = vmatpush.bf16.msrb.mxu3 %v1588_v41  ;;  %v1624_v50 = vor.u32 %v1847_v47, %v1623_v45  ;;  %v1793_v45 = vld [vmem:[#allocation10 + $0x4c] sm:$0xf] }
  0xb5   :  { %v1568_v48 = vor.u32 %v1834_v42, %v1567_v40  ;;  %v1380_v40 = vor.u32 %v1784_v32, %v1377_v33  ;;  %v1508_v42 = vor.u32 %v1816_v35, %v1505_v36  ;;  %v1797_v32 = vld [vmem:[#allocation10 + $0x6c] sm:$0xf]  ;;  %v1433_v33 = vld [vmem:[#allocation10 + $0x78] sm:$0xf0] }
  0xb6   :  { %831 = vmatpush.bf16.msrb.mxu2 %v1412_v11  ;;  %v1436_v35 = vor.u32 %v1797_v32, %v1433_v33  ;;  %v1829_v36 = vld [vmem:[#allocation10 + $0x16c] sm:$0xf]  ;;  %v1852_v33 = vld [vmem:[#allocation11 + $0x20] sm:$0xff] }
  0xb7   :  { %815 = vmatpush.bf16.msrb.mxu1 %v1568_v48  ;;  %802 = vmatpush.bf16.msrb.mxu0 %v1424_v59  ;;  %v1813_v48 = vld [vmem:[#allocation10 + $0xec] sm:$0xf]  ;;  %v1843_v59 = vld [vmem:[#allocation10 + $0x1d4] sm:$0xf0] }
  0xb8   :  { %843 = vmatpush.bf16.msrb.mxu3 %v1572_v53  ;;  %v1500_v51 = vor.u32 %v1813_v48, %v1497_v49  ;;  %v1625_v53 = vld [vmem:[#allocation10 + $0x1f8] sm:$0xf0]  ;;  %v1608_v62 = vor.u32 %v1843_v59, %v1607_v57  ;;  %v1825_v47 = vld [vmem:[#allocation10 + $0x14c] sm:$0xf] }
  0xb9   :  { %v1628_v54 = vor.u32 %v1845_v52, %v1625_v53  ;;  %v1545_v49 = vld [vmem:[#allocation10 + $0x158] sm:$0xf0]  ;;  %v1527_v53 = vld [vmem:[#allocation10 + $0x128] sm:$0xf] }
  0xba   :  { %832 = vmatpush.bf16.msrb.mxu2 %v1396_v24  ;;  %v1833_v24 = vld [vmem:[#allocation10 + $0x18c] sm:$0xf]  ;;  %v1548_v52 = vor.u32 %v1825_v47, %v1545_v49  ;;  %v1401_v57 = vld [vmem:[#allocation10 + $0x38] sm:$0xf0]  ;;  %v1868_v47 = vld [vmem:[#allocation11 + $0xa0] sm:$0xff] }
  0xbb   :  { %816 = vmatpush.bf16.msrb.mxu1 %v1552_v60  ;;  %803 = vmatpush.bf16.msrb.mxu0 %v1408_v9  ;;  %v1809_v60 = vld [vmem:[#allocation10 + $0xcc] sm:$0xf]  ;;  %v1465_v9 = vld [vmem:[#allocation10 + $0xb8] sm:$0xf0]  ;;  %v1580_v26 = vor.u32 %v1833_v24, %v1577_v25 }
  0xbc   :  { %844 = vmatpush.bf16.msrb.mxu3 %v1556_v2  ;;  %v1484_v63 = vor.u32 %v1809_v60, %v1481_v61  ;;  %v1529_v59 = vld [vmem:[#allocation10 + $0x138] sm:$0xf0]  ;;  %v1404_v61 = vor.u32 %v1789_v55, %v1401_v57  ;;  %v1853_v32 = vld [vmem:[#allocation11 + $0x28] sm:$0xff]  ;;  %v1864_v57 = vld [vmem:[#allocation11 + $0x80] sm:$0xff] }
  0xbd   :  { %v1877_v49 = vld [vmem:[#allocation11 + $0xe8] sm:$0xff] }
  0xbe   :  { %833 = vmatpush.bf16.msrb.mxu2 %v1380_v40  ;;  %v1795_v40 = vld [vmem:[#allocation10 + $0x54] sm:$0xf0]  ;;  %v1865_v55 = vld [vmem:[#allocation11 + $0x88] sm:$0xff] }
  0xbf   :  { %817 = vmatpush.bf16.msrb.mxu1 %v1536_v10  ;;  %804 = vmatpush.bf16.msrb.mxu0 %v1392_v21  ;;  %v1592_v10 = vor.u32 %v1839_v7, %v1591_v5  ;;  %v1449_v21 = vld [vmem:[#allocation10 + $0x98] sm:$0xf0]  ;;  %v1817_v5 = vld [vmem:[#allocation10 + $0x10c] sm:$0xf] }
  0xc0   :  { %845 = vmatpush.bf16.msrb.mxu3 %v1540_v15  ;;  %v1447_v15 = vld [vmem:[#allocation10 + $0x88] sm:$0xf] }
  0xc1   :  { %v1448_v18 = vor.u32 %v1803_v16, %v1447_v15 }
  0xc3   :  { %818 = vmatpush.bf16.msrb.mxu1 %v1520_v23  ;;  %805 = vmatpush.bf16.msrb.mxu0 %v1376_v34  ;;  %v1452_v23 = vor.u32 %v1801_v20, %v1449_v21  ;;  %v1560_v34 = vor.u32 %v1831_v31, %v1559_v29  ;;  %v1863_v29 = vld [vmem:[#allocation11 + $0x78] sm:$0xff]  ;;  %v1862_v31 = vld [vmem:[#allocation11 + $0x70] sm:$0xff] }
  0xc4   :  { %846 = vmatpush.bf16.msrb.mxu3 %v1524_v28  ;;  %v1799_v28 = vld [vmem:[#allocation10 + $0x74] sm:$0xf0] }
  0xc7   :  { %819 = vmatpush.bf16.msrb.mxu1 %v1504_v39  ;;  %854 = vmatpush.bf16.msra.mxu0 %v1496_v46  ;;  %v1417_v46 = vld [vmem:[#allocation10 + $0x58] sm:$0xf0] }
  0xc8   :  { %847 = vmatpush.bf16.msrb.mxu3 %v1508_v42  ;;  %v1827_v42 = vld [vmem:[#allocation10 + $0x154] sm:$0xf0]  ;;  %v1420_v48 = vor.u32 %v1793_v45, %v1417_v46  ;;  %v1878_v45 = vld [vmem:[#allocation11 + $0xf0] sm:$0xff]  ;;  %v1848_v46 = vld [vmem:[#allocation11] sm:$0xff] }
  0xcb   :  { %868 = vmatpush.bf16.msra.mxu1 %v1624_v50  ;;  %855 = vmatpush.bf16.msra.mxu0 %v1480_v58  ;;  %v1399_v50 = vld [vmem:[#allocation10 + $0x28] sm:$0xf]  ;;  %v1821_v58 = vld [vmem:[#allocation10 + $0x12c] sm:$0xf] }
  0xcf   :  { %869 = vmatpush.bf16.msra.mxu1 %v1608_v62  ;;  %856 = vmatpush.bf16.msra.mxu0 %v1464_v6  ;;  %v1383_v62 = vld [vmem:[#allocation10 + $0x8] sm:$0xf]  ;;  %v1513_v6 = vld [vmem:[#allocation10 + $0x118] sm:$0xf0] }
  0xd3   :  { %870 = vmatpush.bf16.msra.mxu1 %v1592_v10  ;;  %857 = vmatpush.bf16.msra.mxu0 %v1448_v18  ;;  %v1516_v10 = vor.u32 %v1817_v5, %v1513_v6 }
 0x131   :  { %v260_v1 = vpop.f32.mrf.mxu1 }
 0x132   :  { %v261_v22 = vadd.f32 %v1900_v8, %v260_v1  ;;  %v1609_v1 = vld [vmem:[#allocation10 + $0x1d8] sm:$0xf0] }
 0x133   :  { %v1612_v2 = vor.u32 %v1841_v0, %v1609_v1  ;;  %v1511_v0 = vld [vmem:[#allocation10 + $0x108] sm:$0xf]  ;;  %v1532_v1 = vor.u32 %v1821_v58, %v1529_v59  ;;  %v468_v58 = vld [vmem:[#allocation13 + $0x4] sm:$0xf] }
 0x134   :  { %v265_v37 = vmax.f32 %v261_v22, 0.0  ;;  %v1576_v22 = vor.u32 %v1835_v19, %v1575_v17  ;;  %v1873_v59 = vld [vmem:[#allocation11 + $0xc8] sm:$0xff] }
 0x136   :  { %871 = vmatpush.bf16.msra.mxu1 %v1576_v22 }
 0x139   :  { %v262_v27 = vpop.f32.mrf.mxu1 }
 0x13a   :  { %v263_v30 = vadd.f32 %v1900_v8, %v262_v27  ;;  %v1805_v8 = vld [vmem:[#allocation10 + $0xac] sm:$0xf]  ;;  %v1431_v27 = vld [vmem:[#allocation10 + $0x68] sm:$0xf]  ;;  %872 = vmatpush.bf16.msra.mxu1 %v1560_v34 }
 0x13b   :  { %v1468_v11 = vor.u32 %v1805_v8, %v1465_v9  ;;  %v1388_v9 = vor.u32 %v1785_v3, %v1385_v4  ;;  %v1861_v34 = vld [vmem:[#allocation11 + $0x68] sm:$0xff]  ;;  %v471_v3 = vperm.slane %v468_v58, 1 }
 0x13c   :  { %v266_v38 = vmax.f32 %v263_v30, 0.0  ;;  %v1432_v30 = vor.u32 %v1799_v28, %v1431_v27  ;;  %v1855_v28 = vld [vmem:[#allocation11 + $0x38] sm:$0xff] }
 0x13e   :  { %v267_v41 = vpack.c.bf16 %v266_v38, %v265_v37  ;;  %v1561_v37 = vld [vmem:[#allocation10 + $0x178] sm:$0xf0]  ;;  %v1415_v38 = vld [vmem:[#allocation10 + $0x48] sm:$0xf]  ;;  %858 = vmatpush.bf16.msra.mxu0 %v1432_v30  ;;  %v1854_v30 = vld [vmem:[#allocation11 + $0x30] sm:$0xff] }
 0x13f   :  { %v1564_v39 = vor.u32 %v1829_v36, %v1561_v37  ;;  %v1416_v43 = vor.u32 %v1795_v40, %v1415_v38  ;;  %v1871_v36 = vld [vmem:[#allocation11 + $0xb8] sm:$0xff]  ;;  %v1860_v37 = vld [vmem:[#allocation11 + $0x60] sm:$0xff]  ;;  %v1850_v38 = vld [vmem:[#allocation11 + $0x10] sm:$0xff] }
 0x140   :  { %378 = vmatmul.bf16.vlgmr.msra.gmra.mxu2 %v267_v41  ;;  %392 = vmatmul.bf16.vlgmr.msra.gmra.mxu3 %v267_v41  ;;  %v1543_v41 = vld [vmem:[#allocation10 + $0x148] sm:$0xf]  ;;  %v1859_v40 = vld [vmem:[#allocation11 + $0x58] sm:$0xff] }
 0x141   :  { %882 = vmatpush.bf16.msra.mxu2 %v1500_v51  ;;  %896 = vmatpush.bf16.msra.mxu3 %v1628_v54  ;;  %v1544_v44 = vor.u32 %v1827_v42, %v1543_v41  ;;  %v1791_v51 = vld [vmem:[#allocation10 + $0x34] sm:$0xf0]  ;;  %v1849_v42 = vld [vmem:[#allocation11 + $0x8] sm:$0xff] }
 0x142   :  { %v1823_v54 = vld [vmem:[#allocation10 + $0x134] sm:$0xf0]  ;;  %859 = vmatpush.bf16.msra.mxu0 %v1416_v43  ;;  %v1400_v56 = vor.u32 %v1791_v51, %v1399_v50  ;;  %v1869_v43 = vld [vmem:[#allocation11 + $0xa8] sm:$0xff]  ;;  %v1856_v51 = vld [vmem:[#allocation11 + $0x40] sm:$0xff] }
 0x143   :  { %873 = vmatpush.bf16.msra.mxu1 %v1544_v44  ;;  %v1528_v60 = vor.u32 %v1823_v54, %v1527_v53  ;;  %v1879_v41 = vld [vmem:[#allocation11 + $0xf8] sm:$0xff]  ;;  %v1858_v44 = vld [vmem:[#allocation11 + $0x50] sm:$0xff] }
 0x144   :  { %v1867_v50 = vld [vmem:[#allocation11 + $0x98] sm:$0xff]  ;;  %v1866_v53 = vld [vmem:[#allocation11 + $0x90] sm:$0xff] }
 0x145   :  { %883 = vmatpush.bf16.msra.mxu2 %v1484_v63  ;;  %897 = vmatpush.bf16.msra.mxu3 %v1612_v2  ;;  %v1787_v63 = vld [vmem:[#allocation10 + $0x14] sm:$0xf0] }
 0x146   :  { %v1819_v2 = vld [vmem:[#allocation10 + $0x114] sm:$0xf0]  ;;  %860 = vmatpush.bf16.msra.mxu0 %v1400_v56  ;;  %v1384_v7 = vor.u32 %v1787_v63, %v1383_v62  ;;  %v1874_v56 = vld [vmem:[#allocation11 + $0xd0] sm:$0xff]  ;;  %v470_v62 = vperm.slane %v468_v58, 0  ;;  %v1872_v63 = vld [vmem:[#allocation11 + $0xc0] sm:$0xff] }
 0x147   :  { %874 = vmatpush.bf16.msra.mxu1 %v1528_v60  ;;  %v1512_v8 = vor.u32 %v1819_v2, %v1511_v0  ;;  %v1875_v54 = vld [vmem:[#allocation11 + $0xd8] sm:$0xff] }
 0x149   :  { %884 = vmatpush.bf16.msra.mxu2 %v1468_v11  ;;  %898 = vmatpush.bf16.msra.mxu3 %v1596_v14  ;;  %v284_v11 = vld [vmem:[#allocation13 + $0x2] sm:$0x3] }
 0x14a   :  { %861 = vmatpush.bf16.msra.mxu0 %v1384_v7  ;;  %v286_v14 = vperm.slane %v284_v11, 0  ;;  %v287_v15 = vperm.slane %v284_v11, 1 }
 0x14b   :  { %875 = vmatpush.bf16.msra.mxu1 %v1512_v8 }
 0x14d   :  { %885 = vmatpush.bf16.msra.mxu2 %v1452_v23  ;;  %899 = vmatpush.bf16.msra.mxu3 %v1580_v26 }
 0x151   :  { %886 = vmatpush.bf16.msra.mxu2 %v1436_v35  ;;  %900 = vmatpush.bf16.msra.mxu3 %v1564_v39  ;;  %v1851_v35 = vld [vmem:[#allocation11 + $0x18] sm:$0xff]  ;;  %v1870_v39 = vld [vmem:[#allocation11 + $0xb0] sm:$0xff] }
 0x155   :  { %887 = vmatpush.bf16.msra.mxu2 %v1420_v48  ;;  %901 = vmatpush.bf16.msra.mxu3 %v1548_v52  ;;  %v1857_v48 = vld [vmem:[#allocation11 + $0x48] sm:$0xff]  ;;  %v1876_v52 = vld [vmem:[#allocation11 + $0xe0] sm:$0xff] }
 0x159   :  { %888 = vmatpush.bf16.msra.mxu2 %v1404_v61  ;;  %902 = vmatpush.bf16.msra.mxu3 %v1532_v1 }
 0x15d   :  { %889 = vmatpush.bf16.msra.mxu2 %v1388_v9  ;;  %903 = vmatpush.bf16.msra.mxu3 %v1516_v10 }
 0x1c3   :  { %v379_v12 = vpop.f32.mrf.mxu2  ;;  %v393_v13 = vpop.f32.mrf.mxu3 }
 0x1c4   :  { %v380_v16 = vadd.f32 %v379_v12, %v286_v14  ;;  %v394_v17 = vadd.f32 %v393_v13, %v287_v15 }
 0x1c6   :  { %v398_v22 = vmax.f32 %v380_v16, 0.0  ;;  %v399_v23 = vmax.f32 %v394_v17, 0.0 }
 0x1cb   :  { %v381_v18 = vpop.f32.mrf.mxu2  ;;  %v395_v19 = vpop.f32.mrf.mxu3 }
 0x1cc   :  { %v382_v20 = vadd.f32 %v381_v18, %v286_v14  ;;  %v396_v21 = vadd.f32 %v395_v19, %v287_v15  ;;  %v472_v19 = vperm.slane %v468_v58, 2 }
 0x1ce   :  { %v400_v24 = vmax.f32 %v382_v20, 0.0  ;;  %v401_v25 = vmax.f32 %v396_v21, 0.0 }
 0x1d0   :  { %v402_v26 = vpack.c.bf16 %v400_v24, %v398_v22  ;;  %v403_v27 = vpack.c.bf16 %v401_v25, %v399_v23 }
 0x1d2   :  { %806 = vmatmul.bf16.vlgmr.msrb.gmra.mxu0 %v402_v26  ;;  %820 = vmatmul.bf16.vlgmr.msrb.gmra.mxu1 %v403_v27 }
 0x1d3   :  { %834 = vmatmul.bf16.vlgmr.msrb.gmra.mxu2 %v402_v26  ;;  %848 = vmatmul.bf16.vlgmr.msrb.gmra.mxu3 %v403_v27 }
 0x1d4   :  { %1182 = vmatpush.bf16.msrb.mxu0 %v1855_v28  ;;  %1196 = vmatpush.bf16.msrb.mxu1 %v1863_v29 }
 0x1d5   :  { %1210 = vmatpush.bf16.msrb.mxu2 %v1871_v36  ;;  %1224 = vmatpush.bf16.msrb.mxu3 %v1879_v41 }
 0x1d8   :  { %1183 = vmatpush.bf16.msrb.mxu0 %v1854_v30  ;;  %1197 = vmatpush.bf16.msrb.mxu1 %v1862_v31 }
 0x1d9   :  { %1211 = vmatpush.bf16.msrb.mxu2 %v1870_v39  ;;  %1225 = vmatpush.bf16.msrb.mxu3 %v1878_v45 }
 0x1dc   :  { %1184 = vmatpush.bf16.msrb.mxu0 %v1853_v32  ;;  %1198 = vmatpush.bf16.msrb.mxu1 %v1861_v34 }
 0x1dd   :  { %1212 = vmatpush.bf16.msrb.mxu2 %v1869_v43  ;;  %1226 = vmatpush.bf16.msrb.mxu3 %v1877_v49 }
 0x1e0   :  { %1185 = vmatpush.bf16.msrb.mxu0 %v1852_v33  ;;  %1199 = vmatpush.bf16.msrb.mxu1 %v1860_v37 }
 0x1e1   :  { %1213 = vmatpush.bf16.msrb.mxu2 %v1868_v47  ;;  %1227 = vmatpush.bf16.msrb.mxu3 %v1876_v52 }
 0x1e2   :  { %862 = vmatmul.bf16.vlgmr.msra.gmra.mxu0 %v402_v26  ;;  %876 = vmatmul.bf16.vlgmr.msra.gmra.mxu1 %v403_v27 }
 0x1e3   :  { %890 = vmatmul.bf16.vlgmr.msra.gmra.mxu2 %v402_v26  ;;  %904 = vmatmul.bf16.vlgmr.msra.gmra.mxu3 %v403_v27  ;;  %v473_v27 = vperm.slane %v468_v58, 3 }
 0x1e4   :  { %1186 = vmatpush.bf16.msrb.mxu0 %v1851_v35  ;;  %1200 = vmatpush.bf16.msrb.mxu1 %v1859_v40 }
 0x1e5   :  { %1214 = vmatpush.bf16.msrb.mxu2 %v1867_v50  ;;  %1228 = vmatpush.bf16.msrb.mxu3 %v1875_v54 }
 0x1e8   :  { %1187 = vmatpush.bf16.msrb.mxu0 %v1850_v38  ;;  %1201 = vmatpush.bf16.msrb.mxu1 %v1858_v44 }
 0x1e9   :  { %1215 = vmatpush.bf16.msrb.mxu2 %v1866_v53  ;;  %1229 = vmatpush.bf16.msrb.mxu3 %v1874_v56 }
 0x1ec   :  { %1188 = vmatpush.bf16.msrb.mxu0 %v1849_v42  ;;  %1202 = vmatpush.bf16.msrb.mxu1 %v1857_v48  ;;  %v1901_v48 = vld [vmem:[#allocation13 + $0x8] ss:$0 sm:$0xff] }
 0x1ed   :  { %1216 = vmatpush.bf16.msrb.mxu2 %v1865_v55  ;;  %1230 = vmatpush.bf16.msrb.mxu3 %v1873_v59 }
 0x1f0   :  { %1189 = vmatpush.bf16.msrb.mxu0 %v1848_v46  ;;  %1203 = vmatpush.bf16.msrb.mxu1 %v1856_v51 }
 0x1f1   :  { %1217 = vmatpush.bf16.msrb.mxu2 %v1864_v57  ;;  %1231 = vmatpush.bf16.msrb.mxu3 %v1872_v63 }
 0x24f   :  { %v807_v60 = vpop.f32.mrf.mxu0  ;;  %v821_v61 = vpop.f32.mrf.mxu1 }
 0x250   :  { %v808_v0 = vadd.f32 %v807_v60, %v470_v62 }
 0x252   :  { %v822_v6 = vadd.f32 %v821_v61, %v808_v0 }
 0x254   :  { %v910_v10 = vmax.f32 %v822_v6, 0.0 }
 0x256   :  { %v835_v1 = vpop.f32.mrf.mxu2  ;;  %v849_v2 = vpop.f32.mrf.mxu3 }
 0x257   :  { %v809_v4 = vpop.f32.mrf.mxu0  ;;  %v823_v5 = vpop.f32.mrf.mxu1  ;;  %v836_v9 = vadd.f32 %v835_v1, %v471_v3 }
 0x258   :  { %v810_v7 = vadd.f32 %v809_v4, %v470_v62 }
 0x259   :  { %v850_v15 = vadd.f32 %v849_v2, %v836_v9 }
 0x25a   :  { %v824_v8 = vadd.f32 %v823_v5, %v810_v7 }
 0x25b   :  { %v911_v21 = vmax.f32 %v850_v15, 0.0 }
 0x25c   :  { %v914_v11 = vmax.f32 %v824_v8, 0.0 }
 0x25e   :  { %v918_v12 = vpack.c.bf16 %v914_v11, %v910_v10  ;;  %v837_v13 = vpop.f32.mrf.mxu2  ;;  %v851_v14 = vpop.f32.mrf.mxu3 }
 0x25f   :  { %v838_v16 = vadd.f32 %v837_v13, %v471_v3  ;;  %v863_v17 = vpop.f32.mrf.mxu0  ;;  %v877_v18 = vpop.f32.mrf.mxu1 }
 0x260   :  { %1190 = vmatmul.bf16.vlgmr.msrb.gmra.mxu0 %v918_v12  ;;  %v864_v23 = vadd.f32 %v863_v17, %v472_v19 }
 0x261   :  { %v852_v20 = vadd.f32 %v851_v14, %v838_v16 }
 0x262   :  { %v878_v29 = vadd.f32 %v877_v18, %v864_v23 }
 0x263   :  { %v915_v22 = vmax.f32 %v852_v20, 0.0 }
 0x264   :  { %v912_v34 = vmax.f32 %v878_v29, 0.0 }
 0x265   :  { %v919_v24 = vpack.c.bf16 %v915_v22, %v911_v21 }
 0x266   :  { %v891_v25 = vpop.f32.mrf.mxu2  ;;  %v905_v26 = vpop.f32.mrf.mxu3 }
 0x267   :  { %1204 = vmatmul.bf16.vlgmr.msrb.gmra.mxu1 %v919_v24  ;;  %v865_v28 = vpop.f32.mrf.mxu0  ;;  %v879_v31 = vpop.f32.mrf.mxu1  ;;  %v892_v33 = vadd.f32 %v891_v25, %v473_v27 }
 0x268   :  { %v866_v30 = vadd.f32 %v865_v28, %v472_v19 }
 0x269   :  { %v906_v38 = vadd.f32 %v905_v26, %v892_v33 }
 0x26a   :  { %v880_v32 = vadd.f32 %v879_v31, %v866_v30 }
 0x26b   :  { %v913_v42 = vmax.f32 %v906_v38, 0.0 }
 0x26c   :  { %v916_v35 = vmax.f32 %v880_v32, 0.0 }
 0x26e   :  { %v920_v36 = vpack.c.bf16 %v916_v35, %v912_v34  ;;  %v893_v37 = vpop.f32.mrf.mxu2  ;;  %v907_v40 = vpop.f32.mrf.mxu3 }
 0x26f   :  { %v894_v39 = vadd.f32 %v893_v37, %v473_v27 }
 0x270   :  { %1218 = vmatmul.bf16.vlgmr.msrb.gmra.mxu2 %v920_v36 }
 0x271   :  { %v908_v41 = vadd.f32 %v907_v40, %v894_v39 }
 0x273   :  { %v917_v43 = vmax.f32 %v908_v41, 0.0 }
 0x275   :  { %v921_v44 = vpack.c.bf16 %v917_v43, %v913_v42 }
 0x277   :  { %1232 = vmatmul.bf16.vlgmr.msrb.gmra.mxu3 %v921_v44 }
 0x2dd   :  { %v1191_v45 = vpop.f32.mrf.mxu0 }
 0x2de   :  { %v1192_v52 = vadd.f32 %v1901_v48, %v1191_v45 }
 0x2e4   :  { %v1205_v46 = vpop.f32.mrf.mxu1 }
 0x2e5   :  { %v1193_v49 = vpop.f32.mrf.mxu0  ;;  %v1206_v55 = vadd.f32 %v1205_v46, %v1192_v52 }
 0x2e6   :  { %v1194_v53 = vadd.f32 %v1901_v48, %v1193_v49 }
 0x2ec   :  { %v1207_v51 = vpop.f32.mrf.mxu1 }
 0x2ed   :  { %v1208_v56 = vadd.f32 %v1207_v51, %v1194_v53 }
 0x2f3   :  { %v1219_v47 = vpop.f32.mrf.mxu2 }
 0x2f4   :  { %v1220_v57 = vadd.f32 %v1219_v47, %v1206_v55 }
 0x2fa   :  { %v1233_v50 = vpop.f32.mrf.mxu3 }
 0x2fb   :  { %v1221_v54 = vpop.f32.mrf.mxu2  ;;  %v1234_v60 = vadd.f32 %v1233_v50, %v1220_v57 }
 0x2fc   :  { %v1222_v58 = vadd.f32 %v1221_v54, %v1208_v56 }
 0x302   :  { %v1235_v59 = vpop.f32.mrf.mxu3 }
 0x303   :  { %v1236_v61 = vadd.f32 %v1235_v59, %v1222_v58 }
 0x305   :  { %v1883_v62 = vpack.c.bf16 %v1236_v61, %v1234_v60 }
 0x307   :  { %1884 = vst [vmem:[#allocation14] sm:$0xff] %v1883_v62  }
 0x308   :  { %1254 = dma.vmem_to_hbm [thread:$0]  %s1247_s14, 128, %s1249_s17, [#allocation4], %s2105_s9, %s2105_s9, %s2106_s10  }
 0x309   :  { %2102 = dma.done.wait [#allocation4], 128  }
 0x30a   :  { %2103 = vsyncadd [#allocation4], 4294967168 }
 0x30b   :  { %1259 = vsyncpa [#allocation3], 1 }
 0x30c   :  { %1260 = vsyncpa [#allocation6], 1 }
 0x30d   :  { %1261 = vsyncpa [#allocation9], 1 }
 0x30e   :  { %1262 = vsyncpa [#allocation12], 1 }
 0x30f   :  { %1263 = vsyncpa [#allocation4], 1 }

</bundles_post_ra>
